<compile_context>
chip_gen: v6e
topology: v6e:2x2x1
jax: 0.10.0
libtpu: 0.0.40
codegen_flags: <defaults>
</compile_context>

<pallas_src>
import jax
import jax.numpy as jnp
from jax.experimental import pallas as pl
from jax.experimental.pallas import tpu as pltpu

LANE = 128


def ld_avg_kernel(mw_ref, ld_ref, x_out_ref):
    # mw_ref   : SMEM (N,)           scalar mixing weights
    # ld_ref   : VMEM (N, TR, 128)   lane-dense tile of the flattened M*D axis
    # x_out_ref: VMEM (TR, 128)
    n = ld_ref.shape[0]
    if n <= 8:
        # Tiny neighbor count: static unroll is cheapest.
        acc = ld_ref[0] * mw_ref[0]
        for i in range(1, n):
            acc = acc + ld_ref[i] * mw_ref[i]
    else:
        # Larger N: bounded live ranges via an in-kernel loop.
        def body(i, acc):
            return acc + ld_ref[i] * mw_ref[i]
        acc = jax.lax.fori_loop(1, n, body, ld_ref[0] * mw_ref[0])
    x_out_ref[...] = acc


def ld_avg_forward(ld_input, m_weights, *, rows_per_tile=512):
    """ld_input: (N, M, D); m_weights: (N, 1, 1). Returns x of shape (M, D), f32,
    matching PyTorch LD_AVG.forward (whose internal MLP output is discarded)."""
    n, m, d = ld_input.shape
    L = m * d

    # Lane-dense flatten: (N, M, D) -> (N, L), pad L up to a multiple of 128.
    flat = ld_input.astype(jnp.float32).reshape(n, L)
    r = pl.cdiv(L, LANE)
    if r * LANE != L:
        flat = jnp.pad(flat, ((0, 0), (0, r * LANE - L)))

    # Tile the row axis. rows_per_tile is a multiple of 8 -> (8,128)-friendly blocks.
    if r <= rows_per_tile:
        tr, r_pad = r, r                      # single full-extent block
    else:
        tr = rows_per_tile
        r_pad = pl.cdiv(r, tr) * tr
        if r_pad != r:
            flat = jnp.pad(flat, ((0, 0), (0, (r_pad - r) * LANE)))

    x3 = flat.reshape(n, r_pad, LANE)         # (N, R_pad, 128), lane/sublane dense
    mw = m_weights.astype(jnp.float32).reshape(n)

    grid = (r_pad // tr,)
    out = pl.pallas_call(
        ld_avg_kernel,
        out_shape=jax.ShapeDtypeStruct((r_pad, LANE), jnp.float32),
        grid_spec=pl.GridSpec(
            grid=grid,
            in_specs=[
                pl.BlockSpec(memory_space=pltpu.MemorySpace.SMEM),       # m_weights
                pl.BlockSpec((n, tr, LANE), lambda j: (0, j, 0)),        # ld tile
            ],
            out_specs=pl.BlockSpec((tr, LANE), lambda j: (j, 0)),
        ),
        compiler_params=pltpu.CompilerParams(
            dimension_semantics=("parallel",),   # lets v7x split the grid across TCs
        ),
    )(mw, x3)

    # Undo padding / flattening outside the kernel (free layout plumbing).
    return out.reshape(r_pad * LANE)[:L].reshape(m, d)


def reference_forward(ld_input, m_weights):
    # Pure-JAX reference for the value LD_AVG actually returns.
    return jnp.sum(ld_input.astype(jnp.float32) * m_weights.astype(jnp.float32),
                   axis=0)


def _check(n, m, d, key):
    k_ld, k_w = jax.random.split(key)
    ld_input = jax.random.normal(k_ld, (n, m, d), dtype=jnp.float32)
    # LD_AVG.set_mparam initializes to 1/N; perturb slightly so weights differ per neighbor.
    m_weights = (jnp.full((n, 1, 1), 1.0 / n, dtype=jnp.float32)
                 + 0.01 * jax.random.normal(k_w, (n, 1, 1), dtype=jnp.float32))
    out = jax.block_until_ready(ld_avg_forward(ld_input, m_weights))
    ref = reference_forward(ld_input, m_weights)
    assert out.shape == (m, d)
    assert jnp.allclose(out, ref, atol=1e-5, rtol=1e-5)


if __name__ == "__main__":
    key = jax.random.PRNGKey(0)
    k0, k1, k2 = jax.random.split(key, 3)

    # Primary small case consistent with the module:
    # num_neighbs=4, num_matrices=8, num_labels=16 -> M*D = 128 (one dense lane row).
    _check(n=4, m=8, d=16, key=k0)

    # Exercise the tiled/padded grid path (R=640 > 512 -> grid of 2, row padding).
    _check(n=4, m=2048, d=40, key=k1)

    # Exercise lane padding and the fori_loop reduction path (N > 8, M*D=136).
    _check(n=12, m=8, d=17, key=k2)

    print("KERNEL_OK")
</pallas_src>

<mosaic_0001>
module attributes {stable_mosaic.version = 11 : i64} {
  func.func @ld_avg_kernel(%arg0: i32, %arg1: memref<4xf32, #tpu.memory_space<smem>>, %arg2: memref<4x1x128xf32, #tpu.memory_space<vmem>>, %arg3: memref<1x128xf32, #tpu.memory_space<vmem>>) attributes {dimension_semantics = [#tpu.dimension_semantics<parallel>], iteration_bounds = array<i64: 1>, scalar_prefetch = 0 : i64, scratch_operands = 0 : i64, tpu.core_type = #tpu.core_type<tc>, window_params = [{transform_indices = @transform_0, window_bounds = array<i64: 4>}, {transform_indices = @transform_1, window_bounds = array<i64: 4, 1, 128>}, {transform_indices = @transform_2, window_bounds = array<i64: 1, 128>}]} {
    %c0 = arith.constant 0 : index
    %c0_0 = arith.constant 0 : index
    %c0_1 = arith.constant 0 : index
    %0 = vector.load %arg2[%c0, %c0_0, %c0_1] : memref<4x1x128xf32, #tpu.memory_space<vmem>>, vector<1x1x128xf32>
    %1 = vector.shape_cast %0 : vector<1x1x128xf32> to vector<1x128xf32>
    %c0_2 = arith.constant 0 : index
    %2 = memref.load %arg1[%c0_2] : memref<4xf32, #tpu.memory_space<smem>>
    %3 = vector.broadcast %2 : f32 to vector<1x128xf32>
    %4 = arith.mulf %1, %3 : vector<1x128xf32>
    %c1 = arith.constant 1 : index
    %c0_3 = arith.constant 0 : index
    %c0_4 = arith.constant 0 : index
    %5 = vector.load %arg2[%c1, %c0_3, %c0_4] : memref<4x1x128xf32, #tpu.memory_space<vmem>>, vector<1x1x128xf32>
    %6 = vector.shape_cast %5 : vector<1x1x128xf32> to vector<1x128xf32>
    %c1_5 = arith.constant 1 : index
    %7 = memref.load %arg1[%c1_5] : memref<4xf32, #tpu.memory_space<smem>>
    %8 = vector.broadcast %7 : f32 to vector<1x128xf32>
    %9 = arith.mulf %6, %8 : vector<1x128xf32>
    %10 = arith.addf %4, %9 : vector<1x128xf32>
    %c2 = arith.constant 2 : index
    %c0_6 = arith.constant 0 : index
    %c0_7 = arith.constant 0 : index
    %11 = vector.load %arg2[%c2, %c0_6, %c0_7] : memref<4x1x128xf32, #tpu.memory_space<vmem>>, vector<1x1x128xf32>
    %12 = vector.shape_cast %11 : vector<1x1x128xf32> to vector<1x128xf32>
    %c2_8 = arith.constant 2 : index
    %13 = memref.load %arg1[%c2_8] : memref<4xf32, #tpu.memory_space<smem>>
    %14 = vector.broadcast %13 : f32 to vector<1x128xf32>
    %15 = arith.mulf %12, %14 : vector<1x128xf32>
    %16 = arith.addf %10, %15 : vector<1x128xf32>
    %c3 = arith.constant 3 : index
    %c0_9 = arith.constant 0 : index
    %c0_10 = arith.constant 0 : index
    %17 = vector.load %arg2[%c3, %c0_9, %c0_10] : memref<4x1x128xf32, #tpu.memory_space<vmem>>, vector<1x1x128xf32>
    %18 = vector.shape_cast %17 : vector<1x1x128xf32> to vector<1x128xf32>
    %c3_11 = arith.constant 3 : index
    %19 = memref.load %arg1[%c3_11] : memref<4xf32, #tpu.memory_space<smem>>
    %20 = vector.broadcast %19 : f32 to vector<1x128xf32>
    %21 = arith.mulf %18, %20 : vector<1x128xf32>
    %22 = arith.addf %16, %21 : vector<1x128xf32>
    %c0_12 = arith.constant 0 : index
    %c0_13 = arith.constant 0 : index
    %23 = vector.load %arg3[%c0_12, %c0_13] : memref<1x128xf32, #tpu.memory_space<vmem>>, vector<1x128xf32>
    tpu.vector_store %arg3[%c0_12, %c0_13], %22 {strides = array<i32>} : memref<1x128xf32, #tpu.memory_space<vmem>>, vector<1x128xf32>,
    return
  }
  func.func @transform_0(%arg0: i32) -> i32 {
    %c0_i32 = arith.constant 0 : i32
    %c0_i32_0 = arith.constant 0 : i32
    return %c0_i32 : i32
  }
  func.func @transform_1(%arg0: i32) -> (i32, i32, i32) {
    %c0_i32 = arith.constant 0 : i32
    %c0_i32_0 = arith.constant 0 : i32
    %c0_i32_1 = arith.constant 0 : i32
    return %c0_i32, %arg0, %c0_i32_0 : i32, i32, i32
  }
  func.func @transform_2(%arg0: i32) -> (i32, i32) {
    %c0_i32 = arith.constant 0 : i32
    %c0_i32_0 = arith.constant 0 : i32
    return %arg0, %c0_i32 : i32, i32
  }
}

</mosaic_0001>

<bundles_post_ra>
// kernel: tpu_custom_call.1
= control target key start
LH: loop header
LB: loop body
LE: loop exit
PB: predicated region body
PF: predicated region fallthrough
CT: control target
= control target key end

     0   :  { %7 = vsyncpa [#allocation5], 0  ;;  %s167_s0 = inlined_call_operand.hbm [shape: f32[4], index: 0, kind: input, shape index: {}]   ;;  %s168_s1 = inlined_call_operand.hbm [shape: f32[4,1,128], index: 1, kind: input, shape index: {}]   ;;  %s169_s2 = inlined_call_operand.hbm [shape: f32[1,128], index: 2, kind: output, shape index: {}]  }
   0x1   :  { %8 = vsyncpa [#allocation3], 0 }
   0x2   :  { %9 = vsyncpa [#allocation4], 0  ;;  %s138_s9 = smov [#allocation2]   ;;  %s139_s12 = smov [#allocation6]  }
   0x3   :  { %17 = dma.hbm_to_smem %s167_s0, 16, %s138_s9, [#allocation5]  }
   0x4   :  { %s23_s13 = sshll.u32 %s139_s12, 4  ;;  %s24_s13 = int_to_ptr.vmem [resolvable:$true] %s23_s13 }
   0x5   :  { %s100_s14 = scalar_lea.vmem %s24_s13, 64  ;;  %p105_p1 = scmp.lt.s32.totalorder %s24_s13, %s24_s13 }
   0x6   :  { %p101_p0 = scmp.ne.s32.totalorder %s24_s13, %s100_s14  ;;  %p106_p2 = scmp.lt.s32.totalorder %s100_s14, %s100_s14 }
   0x8   :  { %p107_p3 = por %p106_p2, %p105_p1 }
   0xa   :  { %p108_p4 = pnand %p107_p3, %p101_p0 }
   0xc   :  { %111 = shalt.err (!%p108_p4)
}
   0xd   :  { %s140_s15 = smov 16   ;;  %s141_s16 = smov 1  }
   0xe   :  { %29 = dma.hbm_to_vmem [thread:$0]  %s168_s1, 64, %s24_s13, [#allocation3], %s140_s15, %s140_s15, %s141_s16  }
   0xf   :  { %132 = dma.done.wait [#allocation5], 16  }
  0x10   :  { %133 = vsyncadd [#allocation5], 4294967280 }
  0x11   :  { %134 = dma.done.wait [#allocation3], 64  }
  0x12   :  { %135 = vsyncadd [#allocation3], 4294967232 }
  0x13   :  { %36 = sfence }
  0x14   :  { %s38_s0 = sld [smem:[#allocation2]]  ;;  %v37_v0 = vld [vmem:[#allocation6] sm:$0x1]  ;;  %v42_v1 = vld [vmem:[#allocation6 + $0x1] sm:$0x1]  ;;  %s142_s1 = smov [#allocation7]  }
  0x15   :  { %s76_s19 = sld [smem:[#allocation2 + $0x1]]  ;;  %v48_v3 = vld [vmem:[#allocation6 + $0x2] sm:$0x1]  ;;  %v54_v6 = vld [vmem:[#allocation6 + $0x3] sm:$0x1]  ;;  %s66_s22 = sshll.u32 %s142_s1, 4  ;;  %s67_s22 = int_to_ptr.vmem [resolvable:$true] %s66_s22 }
  0x16   :  { %s77_s20 = sld [smem:[#allocation2 + $0x2]]  ;;  %s112_s23 = scalar_lea.vmem %s67_s22, 16 }
  0x17   :  { %s78_s21 = sld [smem:[#allocation2 + $0x3]]  ;;  %p113_p5 = scmp.ne.s32.totalorder %s67_s22, %s112_s23 }
  0x18   :  { %s116_s24 = scalar_lea.vmem %s67_s22, 32  ;;  %p117_p6 = scmp.lt.s32.totalorder %s67_s22, %s67_s22 }
  0x19   :  { %p118_p7 = scmp.lt.s32.totalorder %s116_s24, %s112_s23 }
  0x1a   :  { %v39_v2 = vstv %s38_s0 }
  0x1b   :  { %v40_v4 = vmul.f32 %v39_v2, %v37_v0  ;;  %v44_v5 = vstv %s76_s19  ;;  %p119_p8 = por %p118_p7, %p117_p6 }
  0x1c   :  { %v45_v7 = vmul.f32 %v44_v5, %v42_v1  ;;  %v50_v8 = vstv %s77_s20 }
  0x1d   :  { %v51_v9 = vmul.f32 %v50_v8, %v48_v3  ;;  %v56_v10 = vstv %s78_s21  ;;  %p120_p9 = pnand %p119_p8, %p113_p5 }
  0x1e   :  { %v46_v11 = vadd.f32 %v45_v7, %v40_v4  ;;  %v57_v12 = vmul.f32 %v56_v10, %v54_v6 }
  0x20   :  { %v52_v13 = vadd.f32 %v51_v9, %v46_v11 }
  0x22   :  { %v58_v14 = vadd.f32 %v57_v12, %v52_v13 }
  0x24   :  { %59 = vst [vmem:[#allocation7] sm:$0x1] %v58_v14 }
  0x25   :  { %123 = shalt.err (!%p120_p9)
}
  0x26   :  { %69 = dma.vmem_to_hbm [thread:$0]  %s67_s22, 16, %s169_s2, [#allocation4]  }
  0x27   :  { %136 = dma.done.wait [#allocation4], 16  }
  0x28   :  { %137 = vsyncadd [#allocation4], 4294967280 }
  0x29   :  { %73 = vsyncpa [#allocation3], 1 }
  0x2a   :  { %74 = vsyncpa [#allocation4], 1 }
  0x2b   :  { %75 = vsyncpa [#allocation5], 1 }

</bundles_post_ra>
